<compile_context>
chip_gen: v6e
topology: v6e:2x2x1
jax: 0.10.0
libtpu: 0.0.40
codegen_flags: <defaults>
</compile_context>

<pallas_src>
import functools
import math

import jax
import jax.numpy as jnp
from jax import lax
from jax.experimental import pallas as pl
from jax.experimental.pallas import tpu as pltpu


# "NT" matmul: contract the last dim of both operands (A @ B.T).
_NT = (((1,), (1,)), ((), ()))


# ---------------------------------------------------------------------------
# Fused kernel
# ---------------------------------------------------------------------------
def _gcn_fused_kernel(x_ref, adj_ref, w1t_ref, b1_ref, w2_ref, b2_ref, *rest,
                      bt, n_nodes, prop_first):
    """Whole GCN forward for one batch tile, entirely in VMEM.

    x_ref  : (bt, obs0, obs1) bf16     adj_ref: (N, N) bf16
    w1t_ref: (N, obs1) bf16 [= W1.T]   b1_ref : (N, 1) f32  [column bias]
    w2_ref : (obs0, obs1) bf16         b2_ref : (1, obs1) f32
    rest   : wf (in,h) bf16, bf (1,h) f32,
             [w_mid (h,h) bf16, b_mid (1,h) f32] * n_mid,
             wlt (out,h) bf16 [= W_last.T], blc (out,1) f32, o_ref (bt,out,N)
    """
    f32, bf16 = jnp.float32, jnp.bfloat16
    N = n_nodes

    o_ref = rest[-1]
    wf_ref, bf_row_ref = rest[0], rest[1]
    wlt_ref, blc_ref = rest[-3], rest[-2]
    mid_refs = rest[2:-3]
    mid_pairs = [(mid_refs[2 * i], mid_refs[2 * i + 1])
                 for i in range(len(mid_refs) // 2)]

    adj = adj_ref[...]                                             # (N, N) bf16

    def propagate(h):
        """Per-batch adj @ h[b]; h: (bt*N, F) f32 -> (bt*N, F) f32."""
        h16 = h.astype(bf16)
        outs = [jnp.dot(adj, h16[b * N:(b + 1) * N, :],
                        preferred_element_type=f32) for b in range(bt)]
        return outs[0] if bt == 1 else jnp.concatenate(outs, axis=0)

    # --- x @ W1 + b1, permute(0,2,1), @ W2 + b2 (computed transposed) --------
    rows = []
    for b in range(bt):
        xb = x_ref[b]                                            # (obs0, obs1)
        u = lax.dot_general(w1t_ref[...], xb, _NT,
                            preferred_element_type=f32)          # (N, obs0)
        u = u + b1_ref[...]                                      # column bias
        hb = jnp.dot(u.astype(bf16), w2_ref[...],
                     preferred_element_type=f32) + b2_ref[...]   # (N, obs1)
        rows.append(hb)
    h = rows[0] if bt == 1 else jnp.concatenate(rows, axis=0)    # (bt*N, obs1)

    # --- First GraphConvolution (in_features -> hidden) ----------------------
    if prop_first:  # adj @ (h @ W) == (adj @ h) @ W ; cheaper when in < hidden
        s = jnp.dot(propagate(h).astype(bf16), wf_ref[...],
                    preferred_element_type=f32)
    else:
        s = propagate(jnp.dot(h.astype(bf16), wf_ref[...],
                              preferred_element_type=f32))
    h = jnp.maximum(s + bf_row_ref[...], 0.0)                    # (bt*N, hidden)

    # --- Middle GraphConvolutions (hidden -> hidden), statically unrolled ----
    for w_ref, b_ref in mid_pairs:
        s = propagate(jnp.dot(h.astype(bf16), w_ref[...],
                              preferred_element_type=f32))
        h = jnp.maximum(s + b_ref[...], 0.0)

    # --- Last GraphConvolution (hidden -> out), computed transposed so the
    # --- output store is lane-dense along the node dimension -----------------
    wlt = wlt_ref[...]                                           # (out, hidden)
    blc = blc_ref[...]                                           # (out, 1)
    h16 = h.astype(bf16)
    for b in range(bt):
        hb = h16[b * N:(b + 1) * N, :]                           # (N, hidden)
        sT = lax.dot_general(wlt, hb, _NT,
                             preferred_element_type=f32)         # (out, N)
        fT = lax.dot_general(sT.astype(bf16), adj, _NT,
                             preferred_element_type=f32)         # (out, N)
        o_ref[b] = jnp.maximum(fT + blc, 0.0).astype(o_ref.dtype)


# ---------------------------------------------------------------------------
# Wrapper
# ---------------------------------------------------------------------------
def _const_spec(a):
    """Full-array operand with a constant block index: DMA'd once, VMEM-resident."""
    nd = a.ndim
    return pl.BlockSpec(a.shape, lambda i, _nd=nd: (0,) * _nd)


def prepare_gcn_params(params):
    """One-time parameter layout prep (transposes / bf16 casts / bias reshapes).

    Done once at init so no per-forward-call HBM copies (stack/transpose) sit
    on the kernel's critical path.
    """
    bf16, f32 = jnp.bfloat16, jnp.float32
    w1 = params["weight1"]                                     # (obs1, N)
    N = w1.shape[1]
    layers = params["layers"]
    wf, bf = layers[0]
    wl, bl = params["last_w"], params["last_b"]
    return {
        "w1t": w1.T.astype(bf16),                              # (N, obs1)
        "b1c": params["bias1"].reshape(N, 1).astype(f32),
        "w2": params["weight2"].astype(bf16),                  # (obs0, obs1)
        "b2r": params["bias2"].reshape(1, -1).astype(f32),
        "wf": wf.astype(bf16),                                 # (in, hidden)
        "bfr": bf.reshape(1, -1).astype(f32),
        "mids": [(w.astype(bf16), b.reshape(1, -1).astype(f32))
                 for (w, b) in layers[1:]],
        "wlt": wl.T.astype(bf16),                              # (out, hidden)
        "blc": bl.reshape(-1, 1).astype(f32),
    }


def _pick_batch_tile(B):
    # v7x has two TensorCores: once per-step work is big enough to hide the
    # ~0.35us grid-step overhead, split the batch into 2 parallel tiles;
    # otherwise fold the whole batch into a single step.
    if B >= 4 and B % 2 == 0:
        return B // 2
    return B


def gcn_forward(prep, x, adj):
    """x: (B, obs0, obs1), adj: (N, N) -> (B, N, out_features) float32."""
    bf16 = jnp.bfloat16
    B, obs0, obs1 = x.shape
    N = adj.shape[0]
    in_ch, hidden = prep["wf"].shape
    out_features = prep["wlt"].shape[0]
    n_mid = len(prep["mids"])

    bt = _pick_batch_tile(B)
    grid = (B // bt,)
    prop_first = in_ch < hidden

    x_bf = x.astype(bf16)
    adj_bf = adj.astype(bf16)

    const_args = [adj_bf, prep["w1t"], prep["b1c"], prep["w2"], prep["b2r"],
                  prep["wf"], prep["bfr"]]
    for (w, b) in prep["mids"]:
        const_args += [w, b]
    const_args += [prep["wlt"], prep["blc"]]

    in_specs = ([pl.BlockSpec((bt, obs0, obs1), lambda i: (i, 0, 0))]
                + [_const_spec(a) for a in const_args])
    out_specs = pl.BlockSpec((bt, out_features, N), lambda i: (i, 0, 0))

    # --- advisory cost estimate ----------------------------------------------
    flops = 4 * B * N * obs0 * obs1                 # the two linear layers
    if prop_first:
        flops += 2 * B * N * N * in_ch + 2 * B * N * in_ch * hidden
    else:
        flops += 2 * B * N * in_ch * hidden + 2 * B * N * N * hidden
    flops += n_mid * (2 * B * N * hidden * hidden + 2 * B * N * N * hidden)
    flops += 2 * B * N * hidden * out_features + 2 * B * N * N * out_features

    def nbytes(a):
        return int(a.size) * a.dtype.itemsize

    out_bytes = B * out_features * N * 4
    bytes_accessed = nbytes(x_bf) + sum(nbytes(a) for a in const_args) + out_bytes
    cost = pl.CostEstimate(flops=int(flops), transcendentals=0,
                           bytes_accessed=int(bytes_accessed))

    # Resident footprint: constants (pipeline-buffered), streamed x/out blocks
    # (double-buffered) + rough activation working set. Raise the scoped-VMEM
    # limit only when this exceeds the smallest default (16 MiB on v5e).
    resident = 2 * sum(nbytes(a) for a in const_args)
    streamed = 2 * (bt * obs0 * obs1 * 2 + bt * out_features * N * 4)
    work = 8 * bt * N * max(obs1, in_ch, hidden) * 4
    need = resident + streamed + work
    compiler_kwargs = {}
    if need > 16 * 2 ** 20:
        compiler_kwargs["vmem_limit_bytes"] = int(min(64 * 2 ** 20, 2 * need))

    kernel = functools.partial(_gcn_fused_kernel, bt=bt, n_nodes=N,
                               prop_first=prop_first)

    out_t = pl.pallas_call(
        kernel,
        out_shape=jax.ShapeDtypeStruct((B, out_features, N), jnp.float32),
        grid_spec=pltpu.PrefetchScalarGridSpec(
            num_scalar_prefetch=0,
            grid=grid,
            in_specs=in_specs,
            out_specs=out_specs,
        ),
        compiler_params=pltpu.CompilerParams(
            dimension_semantics=("parallel",), **compiler_kwargs),
        cost_estimate=cost,
    )(x_bf, *const_args)

    # Kernel writes (B, out_features, N) with the node dim lane-dense;
    # transpose back to the module's (B, N, out_features) layout.
    return jnp.transpose(out_t, (0, 2, 1))


# ---------------------------------------------------------------------------
# GCN parameters (mirrors reset_parameters)
# ---------------------------------------------------------------------------
def init_gcn_params(key, n_layers, in_features, hidden, out_features,
                    total_nodes, observation_space):
    assert n_layers >= 2
    obs0, obs1 = observation_space
    keys = jax.random.split(key, 4 + 2 * n_layers)
    ki = iter(range(len(keys)))

    def unif(k, shape, stdv):
        return jax.random.uniform(k, shape, jnp.float32, -stdv, stdv)

    params = {}
    stdv1 = 1.0 / math.sqrt(total_nodes)
    params["weight1"] = unif(keys[next(ki)], (obs1, total_nodes), stdv1)
    params["bias1"] = unif(keys[next(ki)], (total_nodes,), stdv1)
    stdv2 = 1.0 / math.sqrt(obs1)
    params["weight2"] = unif(keys[next(ki)], (obs0, obs1), stdv2)
    params["bias2"] = unif(keys[next(ki)], (obs1,), stdv2)

    layers = []
    for i in range(n_layers - 1):
        in_ch = in_features if i == 0 else hidden
        stdv = 1.0 / math.sqrt(hidden)
        w = unif(keys[next(ki)], (in_ch, hidden), stdv)
        b = unif(keys[next(ki)], (hidden,), stdv)
        layers.append((w, b))
    params["layers"] = layers
    stdv = 1.0 / math.sqrt(out_features)
    params["last_w"] = unif(keys[next(ki)], (hidden, out_features), stdv)
    params["last_b"] = unif(keys[next(ki)], (out_features,), stdv)
    return params


# ---------------------------------------------------------------------------
# Reference (plain JAX, f32) for sanity check
# ---------------------------------------------------------------------------
def gcn_forward_ref(params, x, adj):
    x = jnp.matmul(x, params["weight1"]) + params["bias1"]
    x = jnp.transpose(x, (0, 2, 1))
    x = jnp.matmul(x, params["weight2"]) + params["bias2"]
    for (w, b) in params["layers"]:
        x = jax.nn.relu(jnp.matmul(adj, jnp.matmul(x, w)) + b)
    x = jax.nn.relu(jnp.matmul(adj, jnp.matmul(x, params["last_w"])) + params["last_b"])
    return x


if __name__ == "__main__":
    B = 2
    observation_space = (8, 16)          # (obs0, obs1)
    total_nodes = 16                     # N
    n_layers = 3
    in_features = observation_space[1]   # first GraphConvolution consumes obs1
    hidden = 32
    out_features = 8

    key = jax.random.PRNGKey(0)
    kp, kx, ka = jax.random.split(key, 3)
    params = init_gcn_params(kp, n_layers, in_features, hidden, out_features,
                             total_nodes, observation_space)
    prep = prepare_gcn_params(params)

    x = jax.random.normal(kx, (B, observation_space[0], observation_space[1]),
                          jnp.float32)
    # Row-normalized random adjacency, (N, N).
    a = jax.random.uniform(ka, (total_nodes, total_nodes), jnp.float32)
    a = a + jnp.eye(total_nodes, dtype=jnp.float32)
    adj = a / jnp.sum(a, axis=-1, keepdims=True)

    fwd = jax.jit(gcn_forward)
    out = jax.block_until_ready(fwd(prep, x, adj))
    ref = jax.block_until_ready(gcn_forward_ref(params, x, adj))

    assert out.shape == (B, total_nodes, out_features)
    err = float(jnp.max(jnp.abs(out - ref)))
    # bf16 MXU operands with f32 accumulation -> loosened tolerance vs f32 ref.
    assert jnp.allclose(out, ref, atol=2e-2, rtol=2e-2), err

    print("KERNEL_OK")
</pallas_src>

<mosaic_0001>
module attributes {stable_mosaic.version = 11 : i64} {
  func.func @_gcn_fused_kernel(%arg0: i32, %arg1: memref<2x8x16xbf16, #tpu.memory_space<vmem>>, %arg2: memref<16x16xbf16, #tpu.memory_space<vmem>>, %arg3: memref<16x16xbf16, #tpu.memory_space<vmem>>, %arg4: memref<16x1xf32, #tpu.memory_space<vmem>>, %arg5: memref<8x16xbf16, #tpu.memory_space<vmem>>, %arg6: memref<1x16xf32, #tpu.memory_space<vmem>>, %arg7: memref<16x32xbf16, #tpu.memory_space<vmem>>, %arg8: memref<1x32xf32, #tpu.memory_space<vmem>>, %arg9: memref<32x32xbf16, #tpu.memory_space<vmem>>, %arg10: memref<1x32xf32, #tpu.memory_space<vmem>>, %arg11: memref<8x32xbf16, #tpu.memory_space<vmem>>, %arg12: memref<8x1xf32, #tpu.memory_space<vmem>>, %arg13: memref<2x8x16xf32, #tpu.memory_space<vmem>>) attributes {dimension_semantics = [#tpu.dimension_semantics<parallel>], iteration_bounds = array<i64: 1>, scalar_prefetch = 0 : i64, scratch_operands = 0 : i64, tpu.core_type = #tpu.core_type<tc>, window_params = [{transform_indices = @transform_0, window_bounds = array<i64: 2, 8, 16>}, {pipeline_mode = #tpu.pipeline_mode<synchronous>, transform_indices = @transform_1, window_bounds = array<i64: 16, 16>}, {pipeline_mode = #tpu.pipeline_mode<synchronous>, transform_indices = @transform_2, window_bounds = array<i64: 16, 16>}, {pipeline_mode = #tpu.pipeline_mode<synchronous>, transform_indices = @transform_3, window_bounds = array<i64: 16, 1>}, {pipeline_mode = #tpu.pipeline_mode<synchronous>, transform_indices = @transform_4, window_bounds = array<i64: 8, 16>}, {pipeline_mode = #tpu.pipeline_mode<synchronous>, transform_indices = @transform_5, window_bounds = array<i64: 1, 16>}, {pipeline_mode = #tpu.pipeline_mode<synchronous>, transform_indices = @transform_6, window_bounds = array<i64: 16, 32>}, {pipeline_mode = #tpu.pipeline_mode<synchronous>, transform_indices = @transform_7, window_bounds = array<i64: 1, 32>}, {pipeline_mode = #tpu.pipeline_mode<synchronous>, transform_indices = @transform_8, window_bounds = array<i64: 32, 32>}, {pipeline_mode = #tpu.pipeline_mode<synchronous>, transform_indices = @transform_9, window_bounds = array<i64: 1, 32>}, {pipeline_mode = #tpu.pipeline_mode<synchronous>, transform_indices = @transform_10, window_bounds = array<i64: 8, 32>}, {pipeline_mode = #tpu.pipeline_mode<synchronous>, transform_indices = @transform_11, window_bounds = array<i64: 8, 1>}, {transform_indices = @transform_12, window_bounds = array<i64: 2, 8, 16>}]} {
    %c0 = arith.constant 0 : index
    %c0_0 = arith.constant 0 : index
    %0 = vector.load %arg2[%c0, %c0_0] : memref<16x16xbf16, #tpu.memory_space<vmem>>, vector<16x16xbf16>
    %c0_1 = arith.constant 0 : index
    %c0_2 = arith.constant 0 : index
    %c0_3 = arith.constant 0 : index
    %1 = vector.load %arg1[%c0_1, %c0_2, %c0_3] : memref<2x8x16xbf16, #tpu.memory_space<vmem>>, vector<1x8x16xbf16>
    %2 = vector.shape_cast %1 : vector<1x8x16xbf16> to vector<8x16xbf16>
    %c0_4 = arith.constant 0 : index
    %c0_5 = arith.constant 0 : index
    %3 = vector.load %arg3[%c0_4, %c0_5] : memref<16x16xbf16, #tpu.memory_space<vmem>>, vector<16x16xbf16>
    %cst = arith.constant dense<0.000000e+00> : vector<16x8xf32>
    %4 = tpu.matmul %3, %2, %cst {dimension_numbers = #tpu.dot_dimension_numbers<[1], [1], [0], [0], [0, 0, 1, 0], [], []>} : vector<16x16xbf16>, vector<8x16xbf16>, vector<16x8xf32> -> vector<16x8xf32>
    %c0_6 = arith.constant 0 : index
    %c0_7 = arith.constant 0 : index
    %5 = vector.load %arg4[%c0_6, %c0_7] : memref<16x1xf32, #tpu.memory_space<vmem>>, vector<16x1xf32>
    %6 = vector.broadcast %5 : vector<16x1xf32> to vector<16x8xf32>
    %7 = arith.addf %4, %6 : vector<16x8xf32>
    %8 = arith.truncf %7 : vector<16x8xf32> to vector<16x8xbf16>
    %c0_8 = arith.constant 0 : index
    %c0_9 = arith.constant 0 : index
    %9 = vector.load %arg5[%c0_8, %c0_9] : memref<8x16xbf16, #tpu.memory_space<vmem>>, vector<8x16xbf16>
    %cst_10 = arith.constant dense<0.000000e+00> : vector<16x16xf32>
    %10 = tpu.matmul %8, %9, %cst_10 {dimension_numbers = #tpu.dot_dimension_numbers<[1], [0], [0], [1], [0, 0, 1, 1], [], []>} : vector<16x8xbf16>, vector<8x16xbf16>, vector<16x16xf32> -> vector<16x16xf32>
    %c0_11 = arith.constant 0 : index
    %c0_12 = arith.constant 0 : index
    %11 = vector.load %arg6[%c0_11, %c0_12] : memref<1x16xf32, #tpu.memory_space<vmem>>, vector<1x16xf32>
    %12 = vector.broadcast %11 : vector<1x16xf32> to vector<16x16xf32>
    %13 = arith.addf %10, %12 : vector<16x16xf32>
    %c1 = arith.constant 1 : index
    %c0_13 = arith.constant 0 : index
    %c0_14 = arith.constant 0 : index
    %14 = vector.load %arg1[%c1, %c0_13, %c0_14] : memref<2x8x16xbf16, #tpu.memory_space<vmem>>, vector<1x8x16xbf16>
    %15 = vector.shape_cast %14 : vector<1x8x16xbf16> to vector<8x16xbf16>
    %c0_15 = arith.constant 0 : index
    %c0_16 = arith.constant 0 : index
    %16 = vector.load %arg3[%c0_15, %c0_16] : memref<16x16xbf16, #tpu.memory_space<vmem>>, vector<16x16xbf16>
    %cst_17 = arith.constant dense<0.000000e+00> : vector<16x8xf32>
    %17 = tpu.matmul %16, %15, %cst_17 {dimension_numbers = #tpu.dot_dimension_numbers<[1], [1], [0], [0], [0, 0, 1, 0], [], []>} : vector<16x16xbf16>, vector<8x16xbf16>, vector<16x8xf32> -> vector<16x8xf32>
    %c0_18 = arith.constant 0 : index
    %c0_19 = arith.constant 0 : index
    %18 = vector.load %arg4[%c0_18, %c0_19] : memref<16x1xf32, #tpu.memory_space<vmem>>, vector<16x1xf32>
    %19 = vector.broadcast %18 : vector<16x1xf32> to vector<16x8xf32>
    %20 = arith.addf %17, %19 : vector<16x8xf32>
    %21 = arith.truncf %20 : vector<16x8xf32> to vector<16x8xbf16>
    %c0_20 = arith.constant 0 : index
    %c0_21 = arith.constant 0 : index
    %22 = vector.load %arg5[%c0_20, %c0_21] : memref<8x16xbf16, #tpu.memory_space<vmem>>, vector<8x16xbf16>
    %cst_22 = arith.constant dense<0.000000e+00> : vector<16x16xf32>
    %23 = tpu.matmul %21, %22, %cst_22 {dimension_numbers = #tpu.dot_dimension_numbers<[1], [0], [0], [1], [0, 0, 1, 1], [], []>} : vector<16x8xbf16>, vector<8x16xbf16>, vector<16x16xf32> -> vector<16x16xf32>
    %c0_23 = arith.constant 0 : index
    %c0_24 = arith.constant 0 : index
    %24 = vector.load %arg6[%c0_23, %c0_24] : memref<1x16xf32, #tpu.memory_space<vmem>>, vector<1x16xf32>
    %25 = vector.broadcast %24 : vector<1x16xf32> to vector<16x16xf32>
    %26 = arith.addf %23, %25 : vector<16x16xf32>
    %27 = tpu.concatenate %13, %26 in 0 : vector<16x16xf32>, vector<16x16xf32> -> vector<32x16xf32>
    %28 = arith.truncf %27 : vector<32x16xf32> to vector<32x16xbf16>
    %29 = vector.extract_strided_slice %28 {offsets = [0, 0], sizes = [16, 16], strides = [1, 1]} : vector<32x16xbf16> to vector<16x16xbf16>
    %cst_25 = arith.constant dense<0.000000e+00> : vector<16x16xf32>
    %30 = tpu.matmul %0, %29, %cst_25 {dimension_numbers = #tpu.dot_dimension_numbers<[1], [0], [0], [1], [0, 0, 1, 1], [], []>} : vector<16x16xbf16>, vector<16x16xbf16>, vector<16x16xf32> -> vector<16x16xf32>
    %31 = vector.extract_strided_slice %28 {offsets = [16, 0], sizes = [16, 16], strides = [1, 1]} : vector<32x16xbf16> to vector<16x16xbf16>
    %cst_26 = arith.constant dense<0.000000e+00> : vector<16x16xf32>
    %32 = tpu.matmul %0, %31, %cst_26 {dimension_numbers = #tpu.dot_dimension_numbers<[1], [0], [0], [1], [0, 0, 1, 1], [], []>} : vector<16x16xbf16>, vector<16x16xbf16>, vector<16x16xf32> -> vector<16x16xf32>
    %33 = tpu.concatenate %30, %32 in 0 : vector<16x16xf32>, vector<16x16xf32> -> vector<32x16xf32>
    %34 = arith.truncf %33 : vector<32x16xf32> to vector<32x16xbf16>
    %c0_27 = arith.constant 0 : index
    %c0_28 = arith.constant 0 : index
    %35 = vector.load %arg7[%c0_27, %c0_28] : memref<16x32xbf16, #tpu.memory_space<vmem>>, vector<16x32xbf16>
    %cst_29 = arith.constant dense<0.000000e+00> : vector<32x32xf32>
    %36 = tpu.matmul %34, %35, %cst_29 {dimension_numbers = #tpu.dot_dimension_numbers<[1], [0], [0], [1], [0, 0, 1, 1], [], []>} : vector<32x16xbf16>, vector<16x32xbf16>, vector<32x32xf32> -> vector<32x32xf32>
    %c0_30 = arith.constant 0 : index
    %c0_31 = arith.constant 0 : index
    %37 = vector.load %arg8[%c0_30, %c0_31] : memref<1x32xf32, #tpu.memory_space<vmem>>, vector<1x32xf32>
    %38 = vector.broadcast %37 : vector<1x32xf32> to vector<32x32xf32>
    %39 = arith.addf %36, %38 : vector<32x32xf32>
    %cst_32 = arith.constant 0.000000e+00 : f32
    %40 = vector.broadcast %cst_32 : f32 to vector<32x32xf32>
    %41 = arith.maximumf %39, %40 : vector<32x32xf32>
    %42 = arith.truncf %41 : vector<32x32xf32> to vector<32x32xbf16>
    %c0_33 = arith.constant 0 : index
    %c0_34 = arith.constant 0 : index
    %43 = vector.load %arg9[%c0_33, %c0_34] : memref<32x32xbf16, #tpu.memory_space<vmem>>, vector<32x32xbf16>
    %cst_35 = arith.constant dense<0.000000e+00> : vector<32x32xf32>
    %44 = tpu.matmul %42, %43, %cst_35 {dimension_numbers = #tpu.dot_dimension_numbers<[1], [0], [0], [1], [0, 0, 1, 1], [], []>} : vector<32x32xbf16>, vector<32x32xbf16>, vector<32x32xf32> -> vector<32x32xf32>
    %45 = arith.truncf %44 : vector<32x32xf32> to vector<32x32xbf16>
    %46 = vector.extract_strided_slice %45 {offsets = [0, 0], sizes = [16, 32], strides = [1, 1]} : vector<32x32xbf16> to vector<16x32xbf16>
    %cst_36 = arith.constant dense<0.000000e+00> : vector<16x32xf32>
    %47 = tpu.matmul %0, %46, %cst_36 {dimension_numbers = #tpu.dot_dimension_numbers<[1], [0], [0], [1], [0, 0, 1, 1], [], []>} : vector<16x16xbf16>, vector<16x32xbf16>, vector<16x32xf32> -> vector<16x32xf32>
    %48 = vector.extract_strided_slice %45 {offsets = [16, 0], sizes = [16, 32], strides = [1, 1]} : vector<32x32xbf16> to vector<16x32xbf16>
    %cst_37 = arith.constant dense<0.000000e+00> : vector<16x32xf32>
    %49 = tpu.matmul %0, %48, %cst_37 {dimension_numbers = #tpu.dot_dimension_numbers<[1], [0], [0], [1], [0, 0, 1, 1], [], []>} : vector<16x16xbf16>, vector<16x32xbf16>, vector<16x32xf32> -> vector<16x32xf32>
    %50 = tpu.concatenate %47, %49 in 0 : vector<16x32xf32>, vector<16x32xf32> -> vector<32x32xf32>
    %c0_38 = arith.constant 0 : index
    %c0_39 = arith.constant 0 : index
    %51 = vector.load %arg10[%c0_38, %c0_39] : memref<1x32xf32, #tpu.memory_space<vmem>>, vector<1x32xf32>
    %52 = vector.broadcast %51 : vector<1x32xf32> to vector<32x32xf32>
    %53 = arith.addf %50, %52 : vector<32x32xf32>
    %cst_40 = arith.constant 0.000000e+00 : f32
    %54 = vector.broadcast %cst_40 : f32 to vector<32x32xf32>
    %55 = arith.maximumf %53, %54 : vector<32x32xf32>
    %c0_41 = arith.constant 0 : index
    %c0_42 = arith.constant 0 : index
    %56 = vector.load %arg11[%c0_41, %c0_42] : memref<8x32xbf16, #tpu.memory_space<vmem>>, vector<8x32xbf16>
    %c0_43 = arith.constant 0 : index
    %c0_44 = arith.constant 0 : index
    %57 = vector.load %arg12[%c0_43, %c0_44] : memref<8x1xf32, #tpu.memory_space<vmem>>, vector<8x1xf32>
    %58 = arith.truncf %55 : vector<32x32xf32> to vector<32x32xbf16>
    %59 = vector.extract_strided_slice %58 {offsets = [0, 0], sizes = [16, 32], strides = [1, 1]} : vector<32x32xbf16> to vector<16x32xbf16>
    %cst_45 = arith.constant dense<0.000000e+00> : vector<8x16xf32>
    %60 = tpu.matmul %56, %59, %cst_45 {dimension_numbers = #tpu.dot_dimension_numbers<[1], [1], [0], [0], [0, 0, 1, 0], [], []>} : vector<8x32xbf16>, vector<16x32xbf16>, vector<8x16xf32> -> vector<8x16xf32>
    %61 = arith.truncf %60 : vector<8x16xf32> to vector<8x16xbf16>
    %cst_46 = arith.constant dense<0.000000e+00> : vector<8x16xf32>
    %62 = tpu.matmul %61, %0, %cst_46 {dimension_numbers = #tpu.dot_dimension_numbers<[1], [1], [0], [0], [0, 0, 1, 0], [], []>} : vector<8x16xbf16>, vector<16x16xbf16>, vector<8x16xf32> -> vector<8x16xf32>
    %63 = vector.broadcast %57 : vector<8x1xf32> to vector<8x16xf32>
    %64 = arith.addf %62, %63 : vector<8x16xf32>
    %cst_47 = arith.constant 0.000000e+00 : f32
    %65 = vector.broadcast %cst_47 : f32 to vector<8x16xf32>
    %66 = arith.maximumf %64, %65 : vector<8x16xf32>
    %c0_48 = arith.constant 0 : index
    %c0_49 = arith.constant 0 : index
    %c0_50 = arith.constant 0 : index
    %67 = vector.load %arg13[%c0_48, %c0_49, %c0_50] : memref<2x8x16xf32, #tpu.memory_space<vmem>>, vector<1x8x16xf32>
    %68 = vector.shape_cast %67 : vector<1x8x16xf32> to vector<8x16xf32>
    %69 = vector.shape_cast %66 : vector<8x16xf32> to vector<1x8x16xf32>
    tpu.vector_store %arg13[%c0_48, %c0_49, %c0_50], %69 {strides = array<i32>} : memref<2x8x16xf32, #tpu.memory_space<vmem>>, vector<1x8x16xf32>,
    %70 = vector.extract_strided_slice %58 {offsets = [16, 0], sizes = [16, 32], strides = [1, 1]} : vector<32x32xbf16> to vector<16x32xbf16>
    %cst_51 = arith.constant dense<0.000000e+00> : vector<8x16xf32>
    %71 = tpu.matmul %56, %70, %cst_51 {dimension_numbers = #tpu.dot_dimension_numbers<[1], [1], [0], [0], [0, 0, 1, 0], [], []>} : vector<8x32xbf16>, vector<16x32xbf16>, vector<8x16xf32> -> vector<8x16xf32>
    %72 = arith.truncf %71 : vector<8x16xf32> to vector<8x16xbf16>
    %cst_52 = arith.constant dense<0.000000e+00> : vector<8x16xf32>
    %73 = tpu.matmul %72, %0, %cst_52 {dimension_numbers = #tpu.dot_dimension_numbers<[1], [1], [0], [0], [0, 0, 1, 0], [], []>} : vector<8x16xbf16>, vector<16x16xbf16>, vector<8x16xf32> -> vector<8x16xf32>
    %74 = vector.broadcast %57 : vector<8x1xf32> to vector<8x16xf32>
    %75 = arith.addf %73, %74 : vector<8x16xf32>
    %cst_53 = arith.constant 0.000000e+00 : f32
    %76 = vector.broadcast %cst_53 : f32 to vector<8x16xf32>
    %77 = arith.maximumf %75, %76 : vector<8x16xf32>
    %c1_54 = arith.constant 1 : index
    %c0_55 = arith.constant 0 : index
    %c0_56 = arith.constant 0 : index
    %78 = vector.load %arg13[%c1_54, %c0_55, %c0_56] : memref<2x8x16xf32, #tpu.memory_space<vmem>>, vector<1x8x16xf32>
    %79 = vector.shape_cast %78 : vector<1x8x16xf32> to vector<8x16xf32>
    %80 = vector.shape_cast %77 : vector<8x16xf32> to vector<1x8x16xf32>
    tpu.vector_store %arg13[%c1_54, %c0_55, %c0_56], %80 {strides = array<i32>} : memref<2x8x16xf32, #tpu.memory_space<vmem>>, vector<1x8x16xf32>,
    return
  }
  func.func @transform_0(%arg0: i32) -> (i32, i32, i32) {
    %c0_i32 = arith.constant 0 : i32
    %c0_i32_0 = arith.constant 0 : i32
    %c0_i32_1 = arith.constant 0 : i32
    return %arg0, %c0_i32, %c0_i32_0 : i32, i32, i32
  }
  func.func @transform_1(%arg0: i32) -> (i32, i32) {
    %c0_i32 = arith.constant 0 : i32
    %c0_i32_0 = arith.constant 0 : i32
    %c0_i32_1 = arith.constant 0 : i32
    return %c0_i32, %c0_i32_0 : i32, i32
  }
  func.func @transform_2(%arg0: i32) -> (i32, i32) {
    %c0_i32 = arith.constant 0 : i32
    %c0_i32_0 = arith.constant 0 : i32
    %c0_i32_1 = arith.constant 0 : i32
    return %c0_i32, %c0_i32_0 : i32, i32
  }
  func.func @transform_3(%arg0: i32) -> (i32, i32) {
    %c0_i32 = arith.constant 0 : i32
    %c0_i32_0 = arith.constant 0 : i32
    %c0_i32_1 = arith.constant 0 : i32
    return %c0_i32, %c0_i32_0 : i32, i32
  }
  func.func @transform_4(%arg0: i32) -> (i32, i32) {
    %c0_i32 = arith.constant 0 : i32
    %c0_i32_0 = arith.constant 0 : i32
    %c0_i32_1 = arith.constant 0 : i32
    return %c0_i32, %c0_i32_0 : i32, i32
  }
  func.func @transform_5(%arg0: i32) -> (i32, i32) {
    %c0_i32 = arith.constant 0 : i32
    %c0_i32_0 = arith.constant 0 : i32
    %c0_i32_1 = arith.constant 0 : i32
    return %c0_i32, %c0_i32_0 : i32, i32
  }
  func.func @transform_6(%arg0: i32) -> (i32, i32) {
    %c0_i32 = arith.constant 0 : i32
    %c0_i32_0 = arith.constant 0 : i32
    %c0_i32_1 = arith.constant 0 : i32
    return %c0_i32, %c0_i32_0 : i32, i32
  }
  func.func @transform_7(%arg0: i32) -> (i32, i32) {
    %c0_i32 = arith.constant 0 : i32
    %c0_i32_0 = arith.constant 0 : i32
    %c0_i32_1 = arith.constant 0 : i32
    return %c0_i32, %c0_i32_0 : i32, i32
  }
  func.func @transform_8(%arg0: i32) -> (i32, i32) {
    %c0_i32 = arith.constant 0 : i32
    %c0_i32_0 = arith.constant 0 : i32
    %c0_i32_1 = arith.constant 0 : i32
    return %c0_i32, %c0_i32_0 : i32, i32
  }
  func.func @transform_9(%arg0: i32) -> (i32, i32) {
    %c0_i32 = arith.constant 0 : i32
    %c0_i32_0 = arith.constant 0 : i32
    %c0_i32_1 = arith.constant 0 : i32
    return %c0_i32, %c0_i32_0 : i32, i32
  }
  func.func @transform_10(%arg0: i32) -> (i32, i32) {
    %c0_i32 = arith.constant 0 : i32
    %c0_i32_0 = arith.constant 0 : i32
    %c0_i32_1 = arith.constant 0 : i32
    return %c0_i32, %c0_i32_0 : i32, i32
  }
  func.func @transform_11(%arg0: i32) -> (i32, i32) {
    %c0_i32 = arith.constant 0 : i32
    %c0_i32_0 = arith.constant 0 : i32
    %c0_i32_1 = arith.constant 0 : i32
    return %c0_i32, %c0_i32_0 : i32, i32
  }
  func.func @transform_12(%arg0: i32) -> (i32, i32, i32) {
    %c0_i32 = arith.constant 0 : i32
    %c0_i32_0 = arith.constant 0 : i32
    %c0_i32_1 = arith.constant 0 : i32
    return %arg0, %c0_i32, %c0_i32_0 : i32, i32, i32
  }
}

</mosaic_0001>

<bundles_post_ra>
// kernel: gcn_forward.1
= control target key start
LH: loop header
LB: loop body
LE: loop exit
PB: predicated region body
PF: predicated region fallthrough
CT: control target
= control target key end

     0   :  { %vm65_vm0 = vcmask 130048   ;;  %v987_v1 = vmov 0.0   ;;  %vm988_vm1 = vmmov 0   ;;  %v989_v3 = vmov 0   ;;  %s1172_s0 = inlined_call_operand.vmem [shape: bf16[2,8,16], index: 0, kind: input, shape index: {}]   ;;  %s1173_s1 = inlined_call_operand.vmem [shape: bf16[16,16], index: 1, kind: input, shape index: {}]   ;;  %s1174_s2 = inlined_call_operand.vmem [shape: bf16[16,16], index: 2, kind: input, shape index: {}]   ;;  %s1175_s3 = inlined_call_operand.vmem [shape: f32[16,1], index: 3, kind: input, shape index: {}]   ;;  %s1176_s4 = inlined_call_operand.vmem [shape: bf16[8,16], index: 4, kind: input, shape index: {}]   ;;  %s1177_s5 = inlined_call_operand.vmem [shape: f32[1,16], index: 5, kind: input, shape index: {}]   ;;  %s1178_s6 = inlined_call_operand.vmem [shape: bf16[16,32], index: 6, kind: input, shape index: {}]   ;;  %s1179_s7 = inlined_call_operand.vmem [shape: f32[1,32], index: 7, kind: input, shape index: {}]   ;;  %s1180_s8 = inlined_call_operand.vmem [shape: bf16[32,32], index: 8, kind: input, shape index: {}]   ;;  %s1181_s9 = inlined_call_operand.vmem [shape: f32[1,32], index: 9, kind: input, shape index: {}]   ;;  %s1182_s10 = inlined_call_operand.vmem [shape: bf16[8,32], index: 10, kind: input, shape index: {}]   ;;  %s1183_s11 = inlined_call_operand.vmem [shape: f32[8,1], index: 11, kind: input, shape index: {}]   ;;  %s1184_s12 = inlined_call_operand.hbm [shape: f32[2,8,16], index: 12, kind: output, shape index: {}]  }
   0x1   :  { %v45_v0 = vld [vmem:[%s1172_s0] sm:$0xf]  ;;  %866 = vmatprep.subr.bf16.mxu0 %v987_v1  ;;  %868 = vmatprep.mubr.msk.bf16.mxu0 %vm988_vm1, %v987_v1  ;;  %v49_v5 = vld [vmem:[%s1175_s3 + $0x8] sm:$0xff] }
   0x2   :  { %v70_v2 = vsel %vm65_vm0, %v45_v0, 0  ;;  %958 = vset.pattern.permute.xlu0 %v989_v3  ;;  %v48_v4 = vld [vmem:[%s1175_s3] sm:$0xff]  ;;  %872 = vmatprep.subr.bf16.mxu1 %v987_v1 }
   0x3   :  { %867 = vmatpush3.bf16.xpose.msra.mxu0 %v70_v2  ;;  %52 = vperm.xlu0 %958, %v48_v4   ;;  %v960_v6 = vld [vmem:[%s1174_s2] sm:$0xff]  }
   0x4   :  { %874 = vmatprep.mubr.msk.bf16.mxu1 %vm988_vm1, %v987_v1  ;;  %884 = vmatprep.subr.bf16.mxu0 %v987_v1 }
   0x5   :  { %959 = vset.pattern.permute.xlu1 %v989_v3 }
   0x6   :  { %17 = vsyncpa [#allocation3], 0  ;;  %v114_v7 = vld [vmem:[%s1176_s4] sm:$0xf]  ;;  %vm126_vm2 = vcmask 1043456   ;;  %vm122_vm3 = vcmask 64512  }
   0x7   :  { %57 = vperm.xlu0 %958, %v49_v5   ;;  %v128_v8 = vsel %vm126_vm2, %v114_v7, 0  ;;  %v814_v14 = vld [vmem:[%s1172_s0 + $0x4] sm:$0xf]  ;;  %v812_v21 = vld [vmem:[%s1177_s5] ss:$0 sm:$0xff]  ;;  %v963_v54 = vld [vmem:[%s1180_s8 + $0x8] sm:$0xff]  }
   0x8   :  { %873 = vmatpush3.bf16.msra.mxu1 %v128_v8  ;;  %v174_v19 = vsel %vm65_vm0, %v814_v14, 0  ;;  %v1106_v35 = vld [vmem:[%s1173_s1] sm:$0xff]   ;;  %vm448_vm4 = vcmask 261120  }
   0x9   :  { %878 = vmatprep.subr.bf16.mxu1 %v987_v1  ;;  %v962_v48 = vld [vmem:[%s1178_s6] sm:$0xff]   ;;  %v270_v14 = vsel %vm65_vm0, %v1106_v35, 0 }
   0xa   :  { %869 = vmatmul.mubr.msk.bf16.vlgmr.msra.gmra.mxu0 %vm65_vm0, %v960_v6  ;;  %v964_v55 = vld [vmem:[%s1180_s8] sm:$0xff]  }
   0xb   :  { %886 = vmatprep.mubr.msk.bf16.mxu0 %vm988_vm1, %v987_v1  ;;  %885 = vmatpush3.bf16.msra.mxu0 %v128_v8  ;;  %v820_v58 = vld [vmem:[%s1179_s7] ss:$0 sm:$0xff] }
   0xc   :  { %896 = vmatprep.subr.bf16.mxu0 %v987_v1 }
  0x7e   :  { %v53_v9 = vpop.permute.xlu0 %52 }
  0x82   :  { %v58_v12 = vpop.permute.xlu0 %57 }
  0xca   :  { %v106_v10 = vpop.f32.mrf.mxu0 }
  0xcb   :  { %v107_v15 = vadd.f32 %v106_v10, %v53_v9 }
  0xcc   :  { %v870_v11 = vpop.f32.mrf.mxu0 }
  0xce   :  { %v109_v13 = vpop.f32.mrf.mxu0 }
  0xcf   :  { %v110_v16 = vadd.f32 %v109_v13, %v58_v12 }
  0xd0   :  { %v871_v17 = vpop.f32.mrf.mxu0 }
  0xd1   :  { %v113_v18 = vpack.c.bf16 %v110_v16, %v107_v15  ;;  %v830_v17 = vld [vmem:[%s1181_s9] ss:$0 sm:$0xff] }
  0xd3   :  { %875 = vmatmul.mubr.msk.bf16.vlgmr.msra.gmra.mxu1 %vm122_vm3, %v113_v18 }
  0xd4   :  { %879 = vmatpush3.bf16.xpose.msra.mxu1 %v174_v19  ;;  %880 = vmatprep.mubr.msk.bf16.mxu1 %vm988_vm1, %v987_v1 }
  0xd5   :  { %890 = vmatprep.subr.bf16.mxu1 %v987_v1 }
  0xdb   :  { %881 = vmatmul.mubr.msk.bf16.vlgmr.msra.gmra.mxu1 %vm65_vm0, %v960_v6 }
  0xdc   :  { %892 = vmatprep.mubr.msk.bf16.mxu1 %vm988_vm1, %v987_v1 }
 0x193   :  { %v164_v20 = vpop.f32.mrf.mxu1 }
 0x194   :  { %v165_v24 = vadd.f32 %v812_v21, %v164_v20 }
 0x195   :  { %v876_v22 = vpop.f32.mrf.mxu1 }
 0x197   :  { %v167_v23 = vpop.f32.mrf.mxu1 }
 0x198   :  { %v168_v25 = vadd.f32 %v812_v21, %v167_v23 }
 0x199   :  { %v877_v26 = vpop.f32.mrf.mxu1 }
 0x19a   :  { %v262_v27 = vpack.c.bf16 %v168_v25, %v165_v24 }
 0x19b   :  { %v210_v28 = vpop.f32.mrf.mxu1 }
 0x19c   :  { %891 = vmatpush3.bf16.msra.mxu1 %v262_v27  ;;  %v211_v31 = vadd.f32 %v210_v28, %v53_v9 }
 0x19d   :  { %v882_v29 = vpop.f32.mrf.mxu1  ;;  %902 = vmatprep.subr.bf16.mxu1 %v962_v48 }
 0x19f   :  { %v213_v30 = vpop.f32.mrf.mxu1  ;;  %893 = vmatmul.mubr.msk.bf16.vlgmr.msra.gmra.mxu1 %vm65_vm0, %v1106_v35 }
 0x1a0   :  { %v214_v32 = vadd.f32 %v213_v30, %v58_v12  ;;  %903 = vmatpush3.bf16.msra.mxu1 %v962_v48 }
 0x1a1   :  { %v883_v33 = vpop.f32.mrf.mxu1  ;;  %916 = vmatprep.subr.bf16.mxu1 %v987_v1 }
 0x1a2   :  { %v217_v34 = vpack.c.bf16 %v214_v32, %v211_v31 }
 0x1a4   :  { %887 = vmatmul.mubr.msk.bf16.vlgmr.msra.gmra.mxu0 %vm122_vm3, %v217_v34 }
 0x1a5   :  { %898 = vmatprep.mubr.msk.bf16.mxu0 %vm988_vm1, %v987_v1 }
 0x25f   :  { %v306_v43 = vpop.f32.mrf.mxu1 }
 0x261   :  { %v894_v44 = vpop.f32.mrf.mxu1 }
 0x263   :  { %v309_v45 = vpop.f32.mrf.mxu1 }
 0x264   :  { %v255_v36 = vpop.f32.mrf.mxu0  ;;  %v354_v46 = vpack.c.bf16 %v309_v45, %v306_v43 }
 0x265   :  { %v256_v39 = vadd.f32 %v812_v21, %v255_v36  ;;  %v895_v47 = vpop.f32.mrf.mxu1 }
 0x266   :  { %v888_v37 = vpop.f32.mrf.mxu0  ;;  %904 = vmatprep.mubr.msk.bf16.mxu1 %vm65_vm0, %v354_v46 }
 0x267   :  { %v604_v37 = vld [vmem:[%s1183_s11] sm:$0xff] }
 0x268   :  { %v258_v38 = vpop.f32.mrf.mxu0  ;;  %656 = vperm.xlu1 %959, %v604_v37  }
 0x269   :  { %v259_v40 = vadd.f32 %v812_v21, %v258_v38 }
 0x26a   :  { %v889_v41 = vpop.f32.mrf.mxu0 }
 0x26b   :  { %v263_v42 = vpack.c.bf16 %v259_v40, %v256_v39 }
 0x26d   :  { %897 = vmatpush3.bf16.msra.mxu0 %v263_v42 }
 0x26e   :  { %908 = vmatprep.subr.bf16.mxu0 %v963_v54 }
 0x270   :  { %899 = vmatmul.mubr.msk.bf16.vlgmr.msra.gmra.mxu0 %vm65_vm0, %v1106_v35 }
 0x271   :  { %909 = vmatpush3.bf16.msra.mxu0 %v963_v54 }
 0x272   :  { %910 = vmatprep.subr.bf16.mxu0 %v964_v55 }
 0x275   :  { %911 = vmatpush3.bf16.msra.mxu0 %v964_v55 }
 0x276   :  { %922 = vmatprep.subr.bf16.mxu0 %v987_v1 }
 0x2e3   :  { %v657_v48 = vpop.permute.xlu1 %656 }
 0x330   :  { %v347_v49 = vpop.f32.mrf.mxu0 }
 0x332   :  { %v900_v50 = vpop.f32.mrf.mxu0 }
 0x334   :  { %v350_v51 = vpop.f32.mrf.mxu0 }
 0x335   :  { %v355_v52 = vpack.c.bf16 %v350_v51, %v347_v49 }
 0x336   :  { %v901_v53 = vpop.f32.mrf.mxu0 }
 0x337   :  { %905 = vmatmul.mubr.msk.bf16.vlgmr.msra.gmra.mxu1 %vm65_vm0, %v355_v52 }
 0x338   :  { %918 = vmatprep.mubr.msk.bf16.mxu1 %vm988_vm1, %v987_v1 }
 0x3f7   :  { %v906_v56 = vpop.f32.mrf.mxu1 }
 0x3f8   :  { %v420_v62 = vadd.f32 %v906_v56, %v820_v58 }
 0x3f9   :  { %v411_v57 = vpop.f32.mrf.mxu1 }
 0x3fa   :  { %v412_v60 = vadd.f32 %v820_v58, %v411_v57  ;;  %v428_v5 = vmax.f32 %v420_v62, 0.0 }
 0x3fb   :  { %v907_v59 = vpop.f32.mrf.mxu1 }
 0x3fc   :  { %v423_v61 = vadd.f32 %v907_v59, %v820_v58  ;;  %v426_v3 = vmax.f32 %v412_v60, 0.0 }
 0x3fd   :  { %v414_v63 = vpop.f32.mrf.mxu1 }
 0x3fe   :  { %v415_v0 = vadd.f32 %v820_v58, %v414_v63  ;;  %v429_v2 = vmax.f32 %v423_v61, 0.0 }
 0x400   :  { %v427_v4 = vmax.f32 %v415_v0, 0.0  ;;  %v431_v7 = vpack.c.bf16 %v429_v2, %v428_v5 }
 0x402   :  { %v430_v6 = vpack.c.bf16 %v427_v4, %v426_v3 }
 0x404   :  { %912 = vmatprep.mubr.msk.bf16.mxu0 %vm448_vm4, %v430_v6 }
 0x405   :  { %913 = vmatmul.mubr.msk.bf16.vlgmr.msra.gmra.mxu0 %vm448_vm4, %v431_v7 }
 0x406   :  { %924 = vmatprep.mubr.msk.bf16.mxu0 %vm988_vm1, %v987_v1 }
 0x4c5   :  { %v914_v8 = vpop.f32.mrf.mxu0 }
 0x4c7   :  { %v489_v9 = vpop.f32.mrf.mxu0 }
 0x4c9   :  { %v915_v10 = vpop.f32.mrf.mxu0 }
 0x4ca   :  { %v505_v11 = vpack.c.bf16 %v915_v10, %v914_v8 }
 0x4cb   :  { %v492_v12 = vpop.f32.mrf.mxu0 }
 0x4cc   :  { %v504_v13 = vpack.c.bf16 %v492_v12, %v489_v9  ;;  %923 = vmatpush3.bf16.msra.mxu0 %v505_v11 }
 0x4cd   :  { %934 = vmatprep.subr.bf16.mxu0 %v987_v1 }
 0x4ce   :  { %917 = vmatpush3.bf16.msra.mxu1 %v504_v13 }
 0x4cf   :  { %925 = vmatmul.mubr.msk.bf16.vlgmr.msra.gmra.mxu0 %vm65_vm0, %v1106_v35  ;;  %928 = vmatprep.subr.bf16.mxu1 %v987_v1 }
 0x4d0   :  { %936 = vmatprep.mubr.msk.bf16.mxu0 %vm988_vm1, %v987_v1  ;;  %935 = vmatpush3.bf16.xpose.msra.mxu0 %v270_v14 }
 0x4d1   :  { %919 = vmatmul.mubr.msk.bf16.vlgmr.msra.gmra.mxu1 %vm65_vm0, %v1106_v35  ;;  %946 = vmatprep.subr.bf16.mxu0 %v987_v1  ;;  %v603_v35 = vld [vmem:[%s1182_s10] sm:$0xf]  ;;  %s990_s10 = smov [#allocation2]  }
 0x4d2   :  { %930 = vmatprep.mubr.msk.bf16.mxu1 %vm988_vm1, %v987_v1  ;;  %s799_s11 = sshll.u32 %s990_s10, 4  ;;  %s800_s11 = int_to_ptr.vmem [resolvable:$true] %s799_s11 }
 0x4d3   :  { %s965_s23 = scalar_lea.vmem %s800_s11, 256  ;;  %p970_p1 = scmp.lt.s32.totalorder %s800_s11, %s800_s11 }
 0x4d4   :  { %p966_p0 = scmp.ne.s32.totalorder %s800_s11, %s965_s23  ;;  %p971_p2 = scmp.lt.s32.totalorder %s965_s23, %s965_s23 }
 0x4d6   :  { %p972_p3 = por %p971_p2, %p970_p1 }
 0x4d8   :  { %p973_p4 = pnand %p972_p3, %p966_p0 }
 0x58f   :  { %v581_v15 = vpop.f32.mrf.mxu0 }
 0x590   :  { %v597_v28 = vadd.f32 %v830_v17, %v581_v15 }
 0x591   :  { %v540_v16 = vpop.f32.mrf.mxu1  ;;  %v926_v18 = vpop.f32.mrf.mxu0 }
 0x592   :  { %v595_v21 = vadd.f32 %v830_v17, %v540_v16  ;;  %v601_v31 = vmax.f32 %v597_v28, 0.0 }
 0x593   :  { %v920_v19 = vpop.f32.mrf.mxu1  ;;  %v584_v20 = vpop.f32.mrf.mxu0 }
 0x594   :  { %v599_v26 = vmax.f32 %v595_v21, 0.0  ;;  %v598_v29 = vadd.f32 %v830_v17, %v584_v20 }
 0x595   :  { %v543_v22 = vpop.f32.mrf.mxu1  ;;  %v927_v23 = vpop.f32.mrf.mxu0 }
 0x596   :  { %v596_v24 = vadd.f32 %v830_v17, %v543_v22  ;;  %v602_v32 = vmax.f32 %v598_v29, 0.0 }
 0x597   :  { %v921_v25 = vpop.f32.mrf.mxu1 }
 0x598   :  { %v600_v27 = vmax.f32 %v596_v24, 0.0  ;;  %v606_v34 = vpack.c.bf16 %v602_v32, %v601_v31 }
 0x59a   :  { %v605_v30 = vpack.c.bf16 %v600_v27, %v599_v26  ;;  %v705_v36 = vsel %vm448_vm4, %v606_v34, 0 }
 0x59c   :  { %v611_v33 = vsel %vm448_vm4, %v605_v30, 0 }
 0x59d   :  { %929 = vmatpush3.bf16.xpose.msra.mxu1 %v611_v33 }
 0x59e   :  { %940 = vmatprep.subr.bf16.mxu1 %v987_v1 }
 0x5a4   :  { %931 = vmatmul.mubr.msk.bf16.vlgmr.msra.gmra.mxu1 %vm448_vm4, %v603_v35 }
 0x5a5   :  { %941 = vmatpush3.bf16.xpose.msra.mxu1 %v705_v36  ;;  %942 = vmatprep.mubr.msk.bf16.mxu1 %vm988_vm1, %v987_v1 }
 0x5ac   :  { %943 = vmatmul.mubr.msk.bf16.vlgmr.msra.gmra.mxu1 %vm448_vm4, %v603_v35 }
 0x664   :  { %v647_v38 = vpop.f32.mrf.mxu1 }
 0x665   :  { %v653_v39 = vpack.c.bf16 %v647_v38, %v647_v38 }
 0x666   :  { %v932_v40 = vpop.f32.mrf.mxu1 }
 0x667   :  { %937 = vmatmul.mubr.msk.bf16.vlgmr.msra.gmra.mxu0 %vm65_vm0, %v653_v39 }
 0x668   :  { %v650_v41 = vpop.f32.mrf.mxu1  ;;  %947 = vmatpush3.bf16.xpose.msra.mxu0 %v270_v14  ;;  %948 = vmatprep.mubr.msk.bf16.mxu0 %vm988_vm1, %v987_v1 }
 0x66a   :  { %v933_v42 = vpop.f32.mrf.mxu1 }
 0x66c   :  { %v741_v43 = vpop.f32.mrf.mxu1 }
 0x66d   :  { %v747_v44 = vpack.c.bf16 %v741_v43, %v741_v43 }
 0x66e   :  { %v944_v45 = vpop.f32.mrf.mxu1 }
 0x66f   :  { %949 = vmatmul.mubr.msk.bf16.vlgmr.msra.gmra.mxu0 %vm65_vm0, %v747_v44 }
 0x670   :  { %v744_v46 = vpop.f32.mrf.mxu1 }
 0x672   :  { %v945_v47 = vpop.f32.mrf.mxu1 }
 0x727   :  { %v696_v49 = vpop.f32.mrf.mxu0 }
 0x728   :  { %v697_v50 = vadd.f32 %v696_v49, %v657_v48 }
 0x729   :  { %v938_v51 = vpop.f32.mrf.mxu0 }
 0x72a   :  { %v702_v52 = vmax.f32 %v697_v50, 0.0 }
 0x72b   :  { %v699_v53 = vpop.f32.mrf.mxu0 }
 0x72c   :  { %703 = vst.msk [vmem:[#allocation2] sm:$0xff] %vm65_vm0, %v702_v52 }
 0x72d   :  { %v939_v54 = vpop.f32.mrf.mxu0 }
 0x72f   :  { %v785_v1 = vpop.f32.mrf.mxu0 }
 0x730   :  { %v786_v55 = vadd.f32 %v785_v1, %v657_v48 }
 0x731   :  { %v950_v56 = vpop.f32.mrf.mxu0 }
 0x732   :  { %v791_v57 = vmax.f32 %v786_v55, 0.0 }
 0x733   :  { %v788_v58 = vpop.f32.mrf.mxu0 }
 0x734   :  { %793 = vst.msk [vmem:[#allocation2 + $0x8] sm:$0xff] %vm65_vm0, %v791_v57 }
 0x735   :  { %v951_v59 = vpop.f32.mrf.mxu0 }
 0x736   :  { %976 = shalt.err (!%p973_p4)
}
 0x737   :  { %s991_s24 = smov 128   ;;  %s992_s25 = smov 8  }
 0x738   :  { %805 = dma.vmem_to_hbm [thread:$0]  %s800_s11, 256, %s1184_s12, [#allocation3], %s991_s24, %s991_s24, %s992_s25  }
 0x739   :  { %985 = dma.done.wait [#allocation3], 256  }
 0x73a   :  { %986 = vsyncadd [#allocation3], 4294967040 }
 0x73b   :  { %809 = vsyncpa [#allocation3], 1 }

</bundles_post_ra>
